<compile_context>
chip_gen: v7x
topology: tpu7x:2x2x1
jax: 0.10.0
libtpu: 0.0.40
codegen_flags: <defaults>
</compile_context>

<pallas_src>
import functools

import jax
import jax.numpy as jnp
from jax.experimental import pallas as pl
from jax.experimental.pallas import tpu as pltpu


# ---------------------------------------------------------------------------
# Tiling / compiler constants
# ---------------------------------------------------------------------------
_LANE = 128
_MAX_TILE_N = 512                        # (tm = tk) Ahat tile; 512x512 bf16 = 512 KiB
_VMEM_LIMIT_BYTES = 48 * 1024 * 1024     # leaves headroom inside v7x's 64 MiB VMEM


def _round_up(x: int, m: int) -> int:
    return ((x + m - 1) // m) * m


# ---------------------------------------------------------------------------
# Kernel 1: row-tiled dense transform  O = [relu](X @ W [+ b])
#   grid = (row tiles,)   W (and bias) fully resident in VMEM.
# ---------------------------------------------------------------------------
def _rowmm_kernel(x_ref, w_ref, b_ref, o_ref, *, apply_bias_relu):
    acc = jnp.dot(x_ref[...], w_ref[...], preferred_element_type=jnp.float32)
    if apply_bias_relu:
        acc = jnp.maximum(acc + b_ref[...], 0.0)
    o_ref[...] = acc.astype(o_ref.dtype)


def _row_transform(x_bf16, w_bf16, b_f32, tm, out_dtype, apply_bias_relu):
    n_pad, k_pad = x_bf16.shape
    f_out_pad = w_bf16.shape[1]
    b2d = b_f32.reshape(1, f_out_pad)
    kernel = functools.partial(_rowmm_kernel, apply_bias_relu=apply_bias_relu)
    return pl.pallas_call(
        kernel,
        out_shape=jax.ShapeDtypeStruct((n_pad, f_out_pad), out_dtype),
        grid=(n_pad // tm,),
        in_specs=[
            pl.BlockSpec((tm, k_pad), lambda i: (i, 0)),
            pl.BlockSpec((k_pad, f_out_pad), lambda i: (0, 0)),
            pl.BlockSpec((1, f_out_pad), lambda i: (0, 0)),
        ],
        out_specs=pl.BlockSpec((tm, f_out_pad), lambda i: (i, 0)),
        compiler_params=pltpu.CompilerParams(
            dimension_semantics=("parallel",),
            vmem_limit_bytes=_VMEM_LIMIT_BYTES,
        ),
    )(x_bf16, w_bf16, b2d)


# ---------------------------------------------------------------------------
# Kernel 2: tiled aggregation  O = [relu](Ahat @ M [+ b])
#   grid = (row tiles [parallel], reduction tiles over N [arbitrary])
#   f32 accumulator scratch; bias + ReLU only in the finalize step.
# ---------------------------------------------------------------------------
def _agg_kernel(a_ref, m_ref, b_ref, o_ref, acc_ref, *, apply_bias_relu):
    k = pl.program_id(1)

    @pl.when(k == 0)
    def _():
        acc_ref[...] = jnp.zeros_like(acc_ref)

    # Pure MXU accumulate in the inner (reduction) loop: bf16 in, f32 acc.
    acc_ref[...] += jnp.dot(
        a_ref[...], m_ref[...], preferred_element_type=jnp.float32
    )

    @pl.when(k == pl.num_programs(1) - 1)
    def _():
        out = acc_ref[...]
        if apply_bias_relu:
            out = jnp.maximum(out + b_ref[...], 0.0)
        o_ref[...] = out.astype(o_ref.dtype)


def _aggregate(a_hat_bf16, m_bf16, b_f32, tm, tk, out_dtype, apply_bias_relu):
    n_pad = a_hat_bf16.shape[0]
    f_cols = m_bf16.shape[1]
    b2d = b_f32.reshape(1, f_cols)
    kernel = functools.partial(_agg_kernel, apply_bias_relu=apply_bias_relu)
    return pl.pallas_call(
        kernel,
        out_shape=jax.ShapeDtypeStruct((n_pad, f_cols), out_dtype),
        grid=(n_pad // tm, n_pad // tk),
        in_specs=[
            pl.BlockSpec((tm, tk), lambda i, k: (i, k)),        # Ahat tile
            pl.BlockSpec((tk, f_cols), lambda i, k: (k, 0)),    # M tile
            pl.BlockSpec((1, f_cols), lambda i, k: (0, 0)),     # bias (resident)
        ],
        out_specs=pl.BlockSpec((tm, f_cols), lambda i, k: (i, 0)),
        scratch_shapes=[pltpu.VMEM((tm, f_cols), jnp.float32)],
        compiler_params=pltpu.CompilerParams(
            dimension_semantics=("parallel", "arbitrary"),
            vmem_limit_bytes=_VMEM_LIMIT_BYTES,
        ),
    )(a_hat_bf16, m_bf16, b2d)


# ---------------------------------------------------------------------------
# Graph glue (plain JAX)
# ---------------------------------------------------------------------------
def build_normalized_adjacency(edge_index, num_nodes):
    """Dense GCN normalization: Ahat = D^{-1/2} (A + I) D^{-1/2}.

    Matches PyG GCNConv gcn_norm with add_self_loops=True, edge_weight=1.
    Row index = target node, column index = source node (source_to_target flow).
    """
    row, col = edge_index[0], edge_index[1]
    a = jnp.zeros((num_nodes, num_nodes), jnp.float32)
    a = a.at[col, row].add(1.0)
    a = a + jnp.eye(num_nodes, dtype=jnp.float32)  # self loops
    deg = a.sum(axis=1)
    dinv = jnp.where(deg > 0, 1.0 / jnp.sqrt(deg), 0.0)
    return dinv[:, None] * a * dinv[None, :]


# ---------------------------------------------------------------------------
# GRACE encoder forward
# ---------------------------------------------------------------------------
def grace_encoder_forward(x, edge_index, params):
    """Forward pass of GRACEEncoder with k layers (each GCNConv + ReLU)."""
    n, f_in = x.shape

    # Tile sizes: 128-aligned, capped at _MAX_TILE_N; N padded to the tile.
    n_pad_base = _round_up(n, _LANE)
    tile_n = min(_MAX_TILE_N, n_pad_base)
    n_pad = _round_up(n, tile_n)
    tm = tk = tile_n

    # Build Ahat once, zero-pad, cast to bf16 for the MXU (f32 accumulation
    # inside the kernels keeps the result accurate). Reused across all layers.
    a_hat = build_normalized_adjacency(edge_index, n)
    a_hat = jnp.pad(a_hat, ((0, n_pad - n), (0, n_pad - n))).astype(jnp.bfloat16)

    # Zero-pad node features to lane-dense shapes.
    f_in_pad0 = _round_up(f_in, _LANE)
    h = jnp.pad(x, ((0, n_pad - n), (0, f_in_pad0 - f_in))).astype(jnp.bfloat16)

    # TODO(synk): fuse all k layers into one pallas_call (Ahat resident in
    # VMEM) when N is small enough, to avoid streaming Ahat from HBM k times.
    # TODO(synk): for large sparse graphs, replace the dense Ahat SpMM with a
    # block-sparse aggregation (PrefetchScalarGridSpec + pl.when tile skip).
    num_layers = len(params)
    for li, (w, b) in enumerate(params):
        f_in_l, f_out_l = w.shape
        f_in_pad = _round_up(f_in_l, _LANE)
        f_out_pad = _round_up(f_out_l, _LANE)
        assert h.shape[1] == f_in_pad, "feature padding mismatch between layers"

        w_pad = jnp.pad(
            w, ((0, f_in_pad - f_in_l), (0, f_out_pad - f_out_l))
        ).astype(jnp.bfloat16)
        b_pad = jnp.pad(b, (0, f_out_pad - f_out_l)).astype(jnp.float32)

        out_dtype = jnp.float32 if li == num_layers - 1 else jnp.bfloat16

        if f_out_pad <= f_in_pad:
            # Order A: transform first, so the O(N^2) aggregation runs over the
            # (narrower) output width.
            xw = _row_transform(
                h, w_pad, b_pad, tm, jnp.bfloat16, apply_bias_relu=False
            )
            h = _aggregate(
                a_hat, xw, b_pad, tm, tk, out_dtype, apply_bias_relu=True
            )
        else:
            # Order B: aggregate first, so the O(N^2) aggregation runs over the
            # (narrower) input width; bias + ReLU fused into the transform.
            ax = _aggregate(
                a_hat, h, b_pad, tm, tk, jnp.bfloat16, apply_bias_relu=False
            )
            h = _row_transform(
                ax, w_pad, b_pad, tm, out_dtype, apply_bias_relu=True
            )

    f_out_final = params[-1][0].shape[1]
    return h[:n, :f_out_final]


def init_params(key, in_channels, out_channels, k=2):
    """Deterministic glorot-style init mirroring GCNConv layer shapes."""
    dims = [in_channels] + [2 * out_channels] * (k - 1) + [out_channels]
    params = []
    for i in range(k):
        key, wk = jax.random.split(key)
        fan_in, fan_out = dims[i], dims[i + 1]
        scale = jnp.sqrt(6.0 / (fan_in + fan_out))
        w = jax.random.uniform(wk, (fan_in, fan_out), jnp.float32, -scale, scale)
        b = jnp.zeros((fan_out,), jnp.float32)
        params.append((w, b))
    return params


if __name__ == "__main__":
    key = jax.random.PRNGKey(0)

    num_nodes = 16
    in_channels = 8
    out_channels = 16  # hidden dim is 2 * out_channels = 32
    k = 2

    key, xk, ek = jax.random.split(key, 3)
    x = jax.random.normal(xk, (num_nodes, in_channels), jnp.float32)

    # Deterministic small edge set (directed pairs); a ring plus a few chords.
    src = jnp.array([0, 1, 2, 3, 4, 5, 6, 7, 8, 9, 10, 11, 12, 13, 14, 15, 0, 3, 6, 9],
                    dtype=jnp.int32)
    dst = jnp.array([1, 2, 3, 4, 5, 6, 7, 8, 9, 10, 11, 12, 13, 14, 15, 0, 8, 11, 14, 1],
                    dtype=jnp.int32)
    edge_index = jnp.stack([src, dst], axis=0)  # [2, E]

    params = init_params(key, in_channels, out_channels, k=k)

    fwd = jax.jit(grace_encoder_forward)  # fuses padding/adjacency glue around the kernels
    out = fwd(x, edge_index, params)
    out = jax.block_until_ready(out)

    assert out.shape == (num_nodes, out_channels)
    assert bool(jnp.all(out >= 0.0))  # ReLU output

    # Pure-JAX reference (f32) to sanity-check the bf16-MXU / f32-acc kernels.
    a_ref = build_normalized_adjacency(edge_index, num_nodes)
    h_ref = x
    for (w, b) in params:
        h_ref = jnp.maximum(a_ref @ (h_ref @ w) + b, 0.0)
    err = jnp.max(jnp.abs(out - h_ref)) / (jnp.max(jnp.abs(h_ref)) + 1e-6)
    assert float(err) < 5e-2, f"relative error too large: {float(err)}"

    print("KERNEL_OK")
</pallas_src>

<mosaic_0001>
module attributes {stable_mosaic.version = 11 : i64} {
  func.func @_agg_kernel(%arg0: i32, %arg1: i32, %arg2: memref<128x128xbf16, #tpu.memory_space<vmem>>, %arg3: memref<128x128xbf16, #tpu.memory_space<vmem>>, %arg4: memref<1x128xf32, #tpu.memory_space<vmem>>, %arg5: memref<128x128xbf16, #tpu.memory_space<vmem>>, %arg6: memref<128x128xf32, #tpu.memory_space<vmem>>) attributes {dimension_semantics = [#tpu.dimension_semantics<parallel>, #tpu.dimension_semantics<arbitrary>], iteration_bounds = array<i64: 1, 1>, scalar_prefetch = 0 : i64, scratch_operands = 1 : i64, tpu.core_type = #tpu.core_type<tc>, window_params = [{transform_indices = @transform_0, window_bounds = array<i64: 128, 128>}, {transform_indices = @transform_1, window_bounds = array<i64: 128, 128>}, {pipeline_mode = #tpu.pipeline_mode<synchronous>, transform_indices = @transform_2, window_bounds = array<i64: 1, 128>}, {transform_indices = @transform_3, window_bounds = array<i64: 128, 128>}]} {
    %c0_i32 = arith.constant 0 : i32
    %0 = arith.cmpi eq, %arg1, %c0_i32 : i32
    %1 = arith.extui %0 : i1 to i32
    %c0_i32_0 = arith.constant 0 : i32
    %2 = arith.cmpi ne, %1, %c0_i32_0 : i32
    scf.if %2 {
      %cst_10 = arith.constant 0.000000e+00 : f32
      %12 = vector.broadcast %cst_10 : f32 to vector<128x128xf32>
      %c0_11 = arith.constant 0 : index
      %c0_12 = arith.constant 0 : index
      %13 = vector.load %arg6[%c0_11, %c0_12] : memref<128x128xf32, #tpu.memory_space<vmem>>, vector<128x128xf32>
      tpu.vector_store %arg6[%c0_11, %c0_12], %12 {strides = array<i32>} : memref<128x128xf32, #tpu.memory_space<vmem>>, vector<128x128xf32>,
    } else {
    }
    %c0 = arith.constant 0 : index
    %c0_1 = arith.constant 0 : index
    %3 = vector.load %arg6[%c0, %c0_1] : memref<128x128xf32, #tpu.memory_space<vmem>>, vector<128x128xf32>
    %c0_2 = arith.constant 0 : index
    %c0_3 = arith.constant 0 : index
    %4 = vector.load %arg2[%c0_2, %c0_3] : memref<128x128xbf16, #tpu.memory_space<vmem>>, vector<128x128xbf16>
    %c0_4 = arith.constant 0 : index
    %c0_5 = arith.constant 0 : index
    %5 = vector.load %arg3[%c0_4, %c0_5] : memref<128x128xbf16, #tpu.memory_space<vmem>>, vector<128x128xbf16>
    %cst = arith.constant dense<0.000000e+00> : vector<128x128xf32>
    %6 = tpu.matmul %4, %5, %cst {dimension_numbers = #tpu.dot_dimension_numbers<[1], [0], [0], [1], [0, 0, 1, 1], [], []>} : vector<128x128xbf16>, vector<128x128xbf16>, vector<128x128xf32> -> vector<128x128xf32>
    %7 = arith.addf %3, %6 : vector<128x128xf32>
    %c0_6 = arith.constant 0 : index
    %c0_7 = arith.constant 0 : index
    %8 = vector.load %arg6[%c0_6, %c0_7] : memref<128x128xf32, #tpu.memory_space<vmem>>, vector<128x128xf32>
    tpu.vector_store %arg6[%c0_6, %c0_7], %7 {strides = array<i32>} : memref<128x128xf32, #tpu.memory_space<vmem>>, vector<128x128xf32>,
    %c0_i32_8 = arith.constant 0 : i32
    %9 = arith.cmpi eq, %arg1, %c0_i32_8 : i32
    %10 = arith.extui %9 : i1 to i32
    %c0_i32_9 = arith.constant 0 : i32
    %11 = arith.cmpi ne, %10, %c0_i32_9 : i32
    scf.if %11 {
      %c0_10 = arith.constant 0 : index
      %c0_11 = arith.constant 0 : index
      %12 = vector.load %arg6[%c0_10, %c0_11] : memref<128x128xf32, #tpu.memory_space<vmem>>, vector<128x128xf32>
      %c0_12 = arith.constant 0 : index
      %c0_13 = arith.constant 0 : index
      %13 = vector.load %arg4[%c0_12, %c0_13] : memref<1x128xf32, #tpu.memory_space<vmem>>, vector<1x128xf32>
      %14 = vector.broadcast %13 : vector<1x128xf32> to vector<128x128xf32>
      %15 = arith.addf %12, %14 : vector<128x128xf32>
      %cst_14 = arith.constant 0.000000e+00 : f32
      %16 = vector.broadcast %cst_14 : f32 to vector<128x128xf32>
      %17 = arith.maximumf %15, %16 : vector<128x128xf32>
      %18 = arith.truncf %17 : vector<128x128xf32> to vector<128x128xbf16>
      %c0_15 = arith.constant 0 : index
      %c0_16 = arith.constant 0 : index
      %19 = vector.load %arg5[%c0_15, %c0_16] : memref<128x128xbf16, #tpu.memory_space<vmem>>, vector<128x128xbf16>
      tpu.vector_store %arg5[%c0_15, %c0_16], %18 {strides = array<i32>} : memref<128x128xbf16, #tpu.memory_space<vmem>>, vector<128x128xbf16>,
    } else {
    }
    return
  }
  func.func @transform_0(%arg0: i32, %arg1: i32) -> (i32, i32) {
    %c0_i32 = arith.constant 0 : i32
    return %arg0, %arg1 : i32, i32
  }
  func.func @transform_1(%arg0: i32, %arg1: i32) -> (i32, i32) {
    %c0_i32 = arith.constant 0 : i32
    %c0_i32_0 = arith.constant 0 : i32
    return %arg1, %c0_i32 : i32, i32
  }
  func.func @transform_2(%arg0: i32, %arg1: i32) -> (i32, i32) {
    %c0_i32 = arith.constant 0 : i32
    %c0_i32_0 = arith.constant 0 : i32
    %c0_i32_1 = arith.constant 0 : i32
    return %c0_i32, %c0_i32_0 : i32, i32
  }
  func.func @transform_3(%arg0: i32, %arg1: i32) -> (i32, i32) {
    %c0_i32 = arith.constant 0 : i32
    %c0_i32_0 = arith.constant 0 : i32
    return %arg0, %c0_i32 : i32, i32
  }
}

module attributes {stable_mosaic.version = 11 : i64} {
  func.func @_rowmm_kernel(%arg0: i32, %arg1: memref<128x128xbf16, #tpu.memory_space<vmem>>, %arg2: memref<128x128xbf16, #tpu.memory_space<vmem>>, %arg3: memref<1x128xf32, #tpu.memory_space<vmem>>, %arg4: memref<128x128xbf16, #tpu.memory_space<vmem>>) attributes {dimension_semantics = [#tpu.dimension_semantics<parallel>], iteration_bounds = array<i64: 1>, scalar_prefetch = 0 : i64, scratch_operands = 0 : i64, tpu.core_type = #tpu.core_type<tc>, window_params = [{transform_indices = @transform_0, window_bounds = array<i64: 128, 128>}, {pipeline_mode = #tpu.pipeline_mode<synchronous>, transform_indices = @transform_1, window_bounds = array<i64: 128, 128>}, {pipeline_mode = #tpu.pipeline_mode<synchronous>, transform_indices = @transform_2, window_bounds = array<i64: 1, 128>}, {transform_indices = @transform_3, window_bounds = array<i64: 128, 128>}]} {
    %c0 = arith.constant 0 : index
    %c0_0 = arith.constant 0 : index
    %0 = vector.load %arg1[%c0, %c0_0] : memref<128x128xbf16, #tpu.memory_space<vmem>>, vector<128x128xbf16>
    %c0_1 = arith.constant 0 : index
    %c0_2 = arith.constant 0 : index
    %1 = vector.load %arg2[%c0_1, %c0_2] : memref<128x128xbf16, #tpu.memory_space<vmem>>, vector<128x128xbf16>
    %cst = arith.constant dense<0.000000e+00> : vector<128x128xf32>
    %2 = tpu.matmul %0, %1, %cst {dimension_numbers = #tpu.dot_dimension_numbers<[1], [0], [0], [1], [0, 0, 1, 1], [], []>} : vector<128x128xbf16>, vector<128x128xbf16>, vector<128x128xf32> -> vector<128x128xf32>
    %3 = arith.truncf %2 : vector<128x128xf32> to vector<128x128xbf16>
    %c0_3 = arith.constant 0 : index
    %c0_4 = arith.constant 0 : index
    %4 = vector.load %arg4[%c0_3, %c0_4] : memref<128x128xbf16, #tpu.memory_space<vmem>>, vector<128x128xbf16>
    tpu.vector_store %arg4[%c0_3, %c0_4], %3 {strides = array<i32>} : memref<128x128xbf16, #tpu.memory_space<vmem>>, vector<128x128xbf16>,
    return
  }
  func.func @transform_0(%arg0: i32) -> (i32, i32) {
    %c0_i32 = arith.constant 0 : i32
    %c0_i32_0 = arith.constant 0 : i32
    return %arg0, %c0_i32 : i32, i32
  }
  func.func @transform_1(%arg0: i32) -> (i32, i32) {
    %c0_i32 = arith.constant 0 : i32
    %c0_i32_0 = arith.constant 0 : i32
    %c0_i32_1 = arith.constant 0 : i32
    return %c0_i32, %c0_i32_0 : i32, i32
  }
  func.func @transform_2(%arg0: i32) -> (i32, i32) {
    %c0_i32 = arith.constant 0 : i32
    %c0_i32_0 = arith.constant 0 : i32
    %c0_i32_1 = arith.constant 0 : i32
    return %c0_i32, %c0_i32_0 : i32, i32
  }
  func.func @transform_3(%arg0: i32) -> (i32, i32) {
    %c0_i32 = arith.constant 0 : i32
    %c0_i32_0 = arith.constant 0 : i32
    return %arg0, %c0_i32 : i32, i32
  }
}

module attributes {stable_mosaic.version = 11 : i64} {
  func.func @_agg_kernel(%arg0: i32, %arg1: i32, %arg2: memref<128x128xbf16, #tpu.memory_space<vmem>>, %arg3: memref<128x128xbf16, #tpu.memory_space<vmem>>, %arg4: memref<1x128xf32, #tpu.memory_space<vmem>>, %arg5: memref<128x128xf32, #tpu.memory_space<vmem>>, %arg6: memref<128x128xf32, #tpu.memory_space<vmem>>) attributes {dimension_semantics = [#tpu.dimension_semantics<parallel>, #tpu.dimension_semantics<arbitrary>], iteration_bounds = array<i64: 1, 1>, scalar_prefetch = 0 : i64, scratch_operands = 1 : i64, tpu.core_type = #tpu.core_type<tc>, window_params = [{transform_indices = @transform_0, window_bounds = array<i64: 128, 128>}, {transform_indices = @transform_1, window_bounds = array<i64: 128, 128>}, {pipeline_mode = #tpu.pipeline_mode<synchronous>, transform_indices = @transform_2, window_bounds = array<i64: 1, 128>}, {transform_indices = @transform_3, window_bounds = array<i64: 128, 128>}]} {
    %c0_i32 = arith.constant 0 : i32
    %0 = arith.cmpi eq, %arg1, %c0_i32 : i32
    %1 = arith.extui %0 : i1 to i32
    %c0_i32_0 = arith.constant 0 : i32
    %2 = arith.cmpi ne, %1, %c0_i32_0 : i32
    scf.if %2 {
      %cst_10 = arith.constant 0.000000e+00 : f32
      %12 = vector.broadcast %cst_10 : f32 to vector<128x128xf32>
      %c0_11 = arith.constant 0 : index
      %c0_12 = arith.constant 0 : index
      %13 = vector.load %arg6[%c0_11, %c0_12] : memref<128x128xf32, #tpu.memory_space<vmem>>, vector<128x128xf32>
      tpu.vector_store %arg6[%c0_11, %c0_12], %12 {strides = array<i32>} : memref<128x128xf32, #tpu.memory_space<vmem>>, vector<128x128xf32>,
    } else {
    }
    %c0 = arith.constant 0 : index
    %c0_1 = arith.constant 0 : index
    %3 = vector.load %arg6[%c0, %c0_1] : memref<128x128xf32, #tpu.memory_space<vmem>>, vector<128x128xf32>
    %c0_2 = arith.constant 0 : index
    %c0_3 = arith.constant 0 : index
    %4 = vector.load %arg2[%c0_2, %c0_3] : memref<128x128xbf16, #tpu.memory_space<vmem>>, vector<128x128xbf16>
    %c0_4 = arith.constant 0 : index
    %c0_5 = arith.constant 0 : index
    %5 = vector.load %arg3[%c0_4, %c0_5] : memref<128x128xbf16, #tpu.memory_space<vmem>>, vector<128x128xbf16>
    %cst = arith.constant dense<0.000000e+00> : vector<128x128xf32>
    %6 = tpu.matmul %4, %5, %cst {dimension_numbers = #tpu.dot_dimension_numbers<[1], [0], [0], [1], [0, 0, 1, 1], [], []>} : vector<128x128xbf16>, vector<128x128xbf16>, vector<128x128xf32> -> vector<128x128xf32>
    %7 = arith.addf %3, %6 : vector<128x128xf32>
    %c0_6 = arith.constant 0 : index
    %c0_7 = arith.constant 0 : index
    %8 = vector.load %arg6[%c0_6, %c0_7] : memref<128x128xf32, #tpu.memory_space<vmem>>, vector<128x128xf32>
    tpu.vector_store %arg6[%c0_6, %c0_7], %7 {strides = array<i32>} : memref<128x128xf32, #tpu.memory_space<vmem>>, vector<128x128xf32>,
    %c0_i32_8 = arith.constant 0 : i32
    %9 = arith.cmpi eq, %arg1, %c0_i32_8 : i32
    %10 = arith.extui %9 : i1 to i32
    %c0_i32_9 = arith.constant 0 : i32
    %11 = arith.cmpi ne, %10, %c0_i32_9 : i32
    scf.if %11 {
      %c0_10 = arith.constant 0 : index
      %c0_11 = arith.constant 0 : index
      %12 = vector.load %arg6[%c0_10, %c0_11] : memref<128x128xf32, #tpu.memory_space<vmem>>, vector<128x128xf32>
      %c0_12 = arith.constant 0 : index
      %c0_13 = arith.constant 0 : index
      %13 = vector.load %arg4[%c0_12, %c0_13] : memref<1x128xf32, #tpu.memory_space<vmem>>, vector<1x128xf32>
      %14 = vector.broadcast %13 : vector<1x128xf32> to vector<128x128xf32>
      %15 = arith.addf %12, %14 : vector<128x128xf32>
      %cst_14 = arith.constant 0.000000e+00 : f32
      %16 = vector.broadcast %cst_14 : f32 to vector<128x128xf32>
      %17 = arith.maximumf %15, %16 : vector<128x128xf32>
      %c0_15 = arith.constant 0 : index
      %c0_16 = arith.constant 0 : index
      %18 = vector.load %arg5[%c0_15, %c0_16] : memref<128x128xf32, #tpu.memory_space<vmem>>, vector<128x128xf32>
      tpu.vector_store %arg5[%c0_15, %c0_16], %17 {strides = array<i32>} : memref<128x128xf32, #tpu.memory_space<vmem>>, vector<128x128xf32>,
    } else {
    }
    return
  }
  func.func @transform_0(%arg0: i32, %arg1: i32) -> (i32, i32) {
    %c0_i32 = arith.constant 0 : i32
    return %arg0, %arg1 : i32, i32
  }
  func.func @transform_1(%arg0: i32, %arg1: i32) -> (i32, i32) {
    %c0_i32 = arith.constant 0 : i32
    %c0_i32_0 = arith.constant 0 : i32
    return %arg1, %c0_i32 : i32, i32
  }
  func.func @transform_2(%arg0: i32, %arg1: i32) -> (i32, i32) {
    %c0_i32 = arith.constant 0 : i32
    %c0_i32_0 = arith.constant 0 : i32
    %c0_i32_1 = arith.constant 0 : i32
    return %c0_i32, %c0_i32_0 : i32, i32
  }
  func.func @transform_3(%arg0: i32, %arg1: i32) -> (i32, i32) {
    %c0_i32 = arith.constant 0 : i32
    %c0_i32_0 = arith.constant 0 : i32
    return %arg0, %c0_i32 : i32, i32
  }
}

</mosaic_0001>

<bundles_post_ra>
// kernel: grace_encoder_forward.4
= control target key start
LH: loop header
LB: loop body
LE: loop exit
PB: predicated region body
PF: predicated region fallthrough
CT: control target
= control target key end

     0   :  { %s591_s1 = inlined_call_operand.vmem [shape: bf16[128,128], index: 1, kind: input, shape index: {}]   ;;  %s592_s2 = inlined_call_operand.vmem [shape: f32[1,128], index: 2, kind: input, shape index: {}]   ;;  %s593_s0 = inlined_call_operand.vmem [shape: bf16[128,128], index: 0, kind: input, shape index: {}]   ;;  %s594_s3 = inlined_call_operand.vmem [shape: bf16[128,128], index: 3, kind: output, shape index: {}]  }
   0x1   :  { %v483_v0 = vld [vmem:[%s591_s1] sm:$0xff]   ;;  %v484_v1 = vld [vmem:[%s591_s1 + $0x8] sm:$0xff]   ;;  %v485_v2 = vld [vmem:[%s591_s1 + $0x10] sm:$0xff]  }
   0x2   :  { %435 = vmatprep.subr.bf16.mxu0 %v483_v0  ;;  %467 = vmatprep.subr.bf16.mxu1 %v483_v0  ;;  %v486_v3 = vld [vmem:[%s591_s1 + $0x18] sm:$0xff]   ;;  %v491_v4 = vld [vmem:[%s593_s0] sm:$0xff]   ;;  %v488_v7 = vld [vmem:[%s591_s1 + $0x28] sm:$0xff]  }
   0x3   :  { %436 = vmatpush3.bf16.msra.mxu0 %v483_v0  ;;  %475 = vmatpush3.bf16.msra.mxu1 %v483_v0  ;;  %v492_v5 = vld [vmem:[%s593_s0 + $0x20] sm:$0xff]   ;;  %v489_v8 = vld [vmem:[%s591_s1 + $0x30] sm:$0xff]   ;;  %v490_v9 = vld [vmem:[%s591_s1 + $0x38] sm:$0xff]  }
   0x4   :  { %437 = vmatprep.subr.bf16.mxu0 %v484_v1  ;;  %468 = vmatprep.subr.bf16.mxu1 %v484_v1  ;;  %v487_v6 = vld [vmem:[%s591_s1 + $0x20] sm:$0xff]   ;;  %v493_v10 = vld [vmem:[%s593_s0 + $0x8] sm:$0xff]   ;;  %v495_v12 = vld [vmem:[%s593_s0 + $0x10] sm:$0xff]  }
   0x5   :  { %451 = vmatprep.mubr.bf16.mxu0 %v491_v4  ;;  %459 = vmatprep.mubr.bf16.mxu1 %v492_v5  ;;  %v494_v11 = vld [vmem:[%s593_s0 + $0x28] sm:$0xff]   ;;  %v496_v13 = vld [vmem:[%s593_s0 + $0x30] sm:$0xff]   ;;  %v497_v14 = vld [vmem:[%s593_s0 + $0x18] sm:$0xff]  }
   0x6   :  { %v498_v15 = vld [vmem:[%s593_s0 + $0x38] sm:$0xff]  }
   0x7   :  { %438 = vmatpush3.bf16.msra.mxu0 %v484_v1  ;;  %476 = vmatpush3.bf16.msra.mxu1 %v484_v1 }
   0x8   :  { %439 = vmatprep.subr.bf16.mxu0 %v485_v2  ;;  %469 = vmatprep.subr.bf16.mxu1 %v485_v2 }
   0xb   :  { %440 = vmatpush3.bf16.msra.mxu0 %v485_v2  ;;  %477 = vmatpush3.bf16.msra.mxu1 %v485_v2 }
   0xc   :  { %441 = vmatprep.subr.bf16.mxu0 %v486_v3  ;;  %470 = vmatprep.subr.bf16.mxu1 %v486_v3 }
   0xf   :  { %442 = vmatpush3.bf16.msra.mxu0 %v486_v3  ;;  %478 = vmatpush3.bf16.msra.mxu1 %v486_v3 }
  0x10   :  { %443 = vmatprep.subr.bf16.mxu0 %v487_v6  ;;  %471 = vmatprep.subr.bf16.mxu1 %v487_v6 }
  0x13   :  { %444 = vmatpush3.bf16.msra.mxu0 %v487_v6  ;;  %479 = vmatpush3.bf16.msra.mxu1 %v487_v6 }
  0x14   :  { %445 = vmatprep.subr.bf16.mxu0 %v488_v7  ;;  %472 = vmatprep.subr.bf16.mxu1 %v488_v7 }
  0x17   :  { %446 = vmatpush3.bf16.msra.mxu0 %v488_v7  ;;  %480 = vmatpush3.bf16.msra.mxu1 %v488_v7 }
  0x18   :  { %447 = vmatprep.subr.bf16.mxu0 %v489_v8  ;;  %473 = vmatprep.subr.bf16.mxu1 %v489_v8 }
  0x1b   :  { %448 = vmatpush3.bf16.msra.mxu0 %v489_v8  ;;  %481 = vmatpush3.bf16.msra.mxu1 %v489_v8 }
  0x1c   :  { %449 = vmatprep.subr.bf16.mxu0 %v490_v9  ;;  %474 = vmatprep.subr.bf16.mxu1 %v490_v9 }
  0x1f   :  { %450 = vmatpush3.bf16.msra.mxu0 %v490_v9  ;;  %482 = vmatpush3.bf16.msra.mxu1 %v490_v9 }
  0x22   :  { %452 = vmatmul.mubr.bf16.vlgmr.msra.gmra.mrb[0].mxu0 %v493_v10  ;;  %460 = vmatmul.mubr.bf16.vlgmr.msra.gmra.mrb[0].mxu1 %v494_v11 }
  0x23   :  { %455 = vmatprep.mubr.bf16.mxu0 %v495_v12  ;;  %463 = vmatprep.mubr.bf16.mxu1 %v496_v13 }
  0x2a   :  { %456 = vmatmul.mubr.bf16.gmra.mrb[4].mxu0 %v497_v14  ;;  %464 = vmatmul.mubr.bf16.gmra.mrb[4].mxu1 %v498_v15 }
  0xf5   :  { %v453_v16 = vpop.f32.mrb[0].mxu0  ;;  %v461_v17 = vpop.f32.mrb[0].mxu1 }
  0xf6   :  { %v177_v18 = vpop.f32.mrb[1].mxu0  ;;  %v209_v19 = vpop.f32.mrb[1].mxu1 }
  0xf7   :  { %v454_v20 = vpop.f32.mrb[2].mxu0  ;;  %v462_v21 = vpop.f32.mrb[2].mxu1 }
  0xf8   :  { %v380_v22 = vpack.c.bf16 %v454_v20, %v453_v16  ;;  %v400_v23 = vpack.c.bf16 %v462_v21, %v461_v17  ;;  %v180_v24 = vpop.f32.mrb[3].mxu0  ;;  %v212_v25 = vpop.f32.mrb[3].mxu1 }
  0xf9   :  { %v375_v26 = vpack.c.bf16 %v180_v24, %v177_v18  ;;  %v395_v27 = vpack.c.bf16 %v212_v25, %v209_v19 }
  0xfa   :  { %412 = vst [vmem:[%s594_s3 + $0x8] sm:$0xff] %v380_v22   ;;  %416 = vst [vmem:[%s594_s3 + $0x28] sm:$0xff] %v400_v23  }
  0xfb   :  { %376 = vst [vmem:[%s594_s3] sm:$0xff] %v375_v26   ;;  %415 = vst [vmem:[%s594_s3 + $0x20] sm:$0xff] %v395_v27  }
  0xfd   :  { %v457_v28 = vpop.f32.mrb[4].mxu0  ;;  %v465_v29 = vpop.f32.mrb[4].mxu1 }
  0xfe   :  { %v193_v30 = vpop.f32.mrb[5].mxu0  ;;  %v225_v31 = vpop.f32.mrb[5].mxu1 }
  0xff   :  { %v458_v32 = vpop.f32.mrb[6].mxu0  ;;  %v466_v33 = vpop.f32.mrb[6].mxu1 }
 0x100   :  { %v390_v34 = vpack.c.bf16 %v458_v32, %v457_v28  ;;  %v410_v35 = vpack.c.bf16 %v466_v33, %v465_v29  ;;  %v196_v36 = vpop.f32.mrb[7].mxu0  ;;  %v228_v37 = vpop.f32.mrb[7].mxu1 }
 0x101   :  { %v385_v38 = vpack.c.bf16 %v196_v36, %v193_v30  ;;  %v405_v39 = vpack.c.bf16 %v228_v37, %v225_v31 }
 0x102   :  { %414 = vst [vmem:[%s594_s3 + $0x18] sm:$0xff] %v390_v34   ;;  %418 = vst [vmem:[%s594_s3 + $0x38] sm:$0xff] %v410_v35  }
 0x103   :  { %413 = vst [vmem:[%s594_s3 + $0x10] sm:$0xff] %v385_v38   ;;  %417 = vst [vmem:[%s594_s3 + $0x30] sm:$0xff] %v405_v39  }

// kernel: grace_encoder_forward.5
= control target key start
LH: loop header
LB: loop body
LE: loop exit
PB: predicated region body
PF: predicated region fallthrough
CT: control target
= control target key end

     0   :  { %s721_s1 = inlined_call_operand.vmem [shape: bf16[128,128], index: 1, kind: input, shape index: {}]   ;;  %s722_s0 = inlined_call_operand.vmem [shape: bf16[128,128], index: 0, kind: input, shape index: {}]   ;;  %s723_s2 = inlined_call_operand.vmem [shape: f32[1,128], index: 2, kind: input, shape index: {}]   ;;  %s724_s3 = inlined_call_operand.vmem [shape: bf16[128,128], index: 3, kind: output, shape index: {}]  }
   0x1   :  { %v610_v0 = vld [vmem:[%s721_s1] sm:$0xff]   ;;  %v611_v1 = vld [vmem:[%s721_s1 + $0x8] sm:$0xff]   ;;  %v612_v2 = vld [vmem:[%s721_s1 + $0x10] sm:$0xff]  }
   0x2   :  { %562 = vmatprep.subr.bf16.mxu0 %v610_v0  ;;  %594 = vmatprep.subr.bf16.mxu1 %v610_v0  ;;  %v613_v3 = vld [vmem:[%s721_s1 + $0x18] sm:$0xff]   ;;  %v618_v4 = vld [vmem:[%s722_s0] sm:$0xff]   ;;  %v615_v7 = vld [vmem:[%s721_s1 + $0x28] sm:$0xff]  }
   0x3   :  { %563 = vmatpush3.bf16.msra.mxu0 %v610_v0  ;;  %602 = vmatpush3.bf16.msra.mxu1 %v610_v0  ;;  %v619_v5 = vld [vmem:[%s722_s0 + $0x20] sm:$0xff]   ;;  %v616_v8 = vld [vmem:[%s721_s1 + $0x30] sm:$0xff]   ;;  %v617_v9 = vld [vmem:[%s721_s1 + $0x38] sm:$0xff]  }
   0x4   :  { %564 = vmatprep.subr.bf16.mxu0 %v611_v1  ;;  %595 = vmatprep.subr.bf16.mxu1 %v611_v1  ;;  %v614_v6 = vld [vmem:[%s721_s1 + $0x20] sm:$0xff]   ;;  %v620_v10 = vld [vmem:[%s722_s0 + $0x8] sm:$0xff]   ;;  %v622_v12 = vld [vmem:[%s722_s0 + $0x10] sm:$0xff]  }
   0x5   :  { %578 = vmatprep.mubr.bf16.mxu0 %v618_v4  ;;  %586 = vmatprep.mubr.bf16.mxu1 %v619_v5  ;;  %v621_v11 = vld [vmem:[%s722_s0 + $0x28] sm:$0xff]   ;;  %v623_v13 = vld [vmem:[%s722_s0 + $0x30] sm:$0xff]   ;;  %v624_v14 = vld [vmem:[%s722_s0 + $0x18] sm:$0xff]  }
   0x6   :  { %v625_v15 = vld [vmem:[%s722_s0 + $0x38] sm:$0xff]   ;;  %v466_v16 = vld [vmem:[%s723_s2] ss:$0 sm:$0xff] }
   0x7   :  { %565 = vmatpush3.bf16.msra.mxu0 %v611_v1  ;;  %603 = vmatpush3.bf16.msra.mxu1 %v611_v1 }
   0x8   :  { %566 = vmatprep.subr.bf16.mxu0 %v612_v2  ;;  %596 = vmatprep.subr.bf16.mxu1 %v612_v2 }
   0xb   :  { %567 = vmatpush3.bf16.msra.mxu0 %v612_v2  ;;  %604 = vmatpush3.bf16.msra.mxu1 %v612_v2 }
   0xc   :  { %568 = vmatprep.subr.bf16.mxu0 %v613_v3  ;;  %597 = vmatprep.subr.bf16.mxu1 %v613_v3 }
   0xf   :  { %569 = vmatpush3.bf16.msra.mxu0 %v613_v3  ;;  %605 = vmatpush3.bf16.msra.mxu1 %v613_v3 }
  0x10   :  { %570 = vmatprep.subr.bf16.mxu0 %v614_v6  ;;  %598 = vmatprep.subr.bf16.mxu1 %v614_v6 }
  0x13   :  { %571 = vmatpush3.bf16.msra.mxu0 %v614_v6  ;;  %606 = vmatpush3.bf16.msra.mxu1 %v614_v6 }
  0x14   :  { %572 = vmatprep.subr.bf16.mxu0 %v615_v7  ;;  %599 = vmatprep.subr.bf16.mxu1 %v615_v7 }
  0x17   :  { %573 = vmatpush3.bf16.msra.mxu0 %v615_v7  ;;  %607 = vmatpush3.bf16.msra.mxu1 %v615_v7 }
  0x18   :  { %574 = vmatprep.subr.bf16.mxu0 %v616_v8  ;;  %600 = vmatprep.subr.bf16.mxu1 %v616_v8 }
  0x1b   :  { %575 = vmatpush3.bf16.msra.mxu0 %v616_v8  ;;  %608 = vmatpush3.bf16.msra.mxu1 %v616_v8 }
  0x1c   :  { %576 = vmatprep.subr.bf16.mxu0 %v617_v9  ;;  %601 = vmatprep.subr.bf16.mxu1 %v617_v9 }
  0x1f   :  { %577 = vmatpush3.bf16.msra.mxu0 %v617_v9  ;;  %609 = vmatpush3.bf16.msra.mxu1 %v617_v9 }
  0x22   :  { %579 = vmatmul.mubr.bf16.vlgmr.msra.gmra.mrb[0].mxu0 %v620_v10  ;;  %587 = vmatmul.mubr.bf16.vlgmr.msra.gmra.mrb[0].mxu1 %v621_v11 }
  0x23   :  { %582 = vmatprep.mubr.bf16.mxu0 %v622_v12  ;;  %590 = vmatprep.mubr.bf16.mxu1 %v623_v13 }
  0x2a   :  { %583 = vmatmul.mubr.bf16.gmra.mrb[4].mxu0 %v624_v14  ;;  %591 = vmatmul.mubr.bf16.gmra.mrb[4].mxu1 %v625_v15 }
  0xf5   :  { %v580_v17 = vpop.f32.mrb[0].mxu0  ;;  %v588_v18 = vpop.f32.mrb[0].mxu1 }
  0xf6   :  { %v336_v19 = vadd.f32 %v580_v17, %v466_v16  ;;  %v344_v20 = vadd.f32 %v588_v18, %v466_v16  ;;  %v213_v21 = vpop.f32.mrb[1].mxu0  ;;  %v245_v22 = vpop.f32.mrb[1].mxu1 }
  0xf7   :  { %v334_v23 = vadd.f32 %v466_v16, %v213_v21  ;;  %v342_v24 = vadd.f32 %v466_v16, %v245_v22  ;;  %v581_v25 = vpop.f32.mrb[2].mxu0  ;;  %v589_v26 = vpop.f32.mrb[2].mxu1 }
  0xf8   :  { %v337_v27 = vadd.f32 %v581_v25, %v466_v16  ;;  %v345_v28 = vadd.f32 %v589_v26, %v466_v16  ;;  %v216_v29 = vpop.f32.mrb[3].mxu0  ;;  %v248_v30 = vpop.f32.mrb[3].mxu1  ;;  %v352_v33 = vmax.f32 %v336_v19, 0.0  ;;  %v360_v34 = vmax.f32 %v344_v20, 0.0 }
  0xf9   :  { %v335_v31 = vadd.f32 %v466_v16, %v216_v29  ;;  %v343_v32 = vadd.f32 %v466_v16, %v248_v30  ;;  %v350_v37 = vmax.f32 %v334_v23, 0.0  ;;  %v358_v38 = vmax.f32 %v342_v24, 0.0 }
  0xfa   :  { %v353_v35 = vmax.f32 %v337_v27, 0.0  ;;  %v361_v36 = vmax.f32 %v345_v28, 0.0 }
  0xfb   :  { %v351_v39 = vmax.f32 %v335_v31, 0.0  ;;  %v359_v40 = vmax.f32 %v343_v32, 0.0 }
  0xfc   :  { %v507_v41 = vpack.c.bf16 %v353_v35, %v352_v33  ;;  %v527_v42 = vpack.c.bf16 %v361_v36, %v360_v34 }
  0xfd   :  { %v502_v43 = vpack.c.bf16 %v351_v39, %v350_v37  ;;  %v522_v44 = vpack.c.bf16 %v359_v40, %v358_v38  ;;  %v584_v45 = vpop.f32.mrb[4].mxu0  ;;  %v592_v46 = vpop.f32.mrb[4].mxu1 }
  0xfe   :  { %539 = vst [vmem:[%s724_s3 + $0x8] sm:$0xff] %v507_v41   ;;  %543 = vst [vmem:[%s724_s3 + $0x28] sm:$0xff] %v527_v42   ;;  %v340_v47 = vadd.f32 %v584_v45, %v466_v16  ;;  %v348_v48 = vadd.f32 %v592_v46, %v466_v16  ;;  %v229_v49 = vpop.f32.mrb[5].mxu0  ;;  %v261_v50 = vpop.f32.mrb[5].mxu1 }
  0xff   :  { %503 = vst [vmem:[%s724_s3] sm:$0xff] %v502_v43   ;;  %542 = vst [vmem:[%s724_s3 + $0x20] sm:$0xff] %v522_v44   ;;  %v338_v51 = vadd.f32 %v466_v16, %v229_v49  ;;  %v346_v52 = vadd.f32 %v466_v16, %v261_v50  ;;  %v585_v53 = vpop.f32.mrb[6].mxu0  ;;  %v593_v54 = vpop.f32.mrb[6].mxu1 }
 0x100   :  { %v341_v55 = vadd.f32 %v585_v53, %v466_v16  ;;  %v349_v56 = vadd.f32 %v593_v54, %v466_v16  ;;  %v232_v57 = vpop.f32.mrb[7].mxu0  ;;  %v264_v58 = vpop.f32.mrb[7].mxu1  ;;  %v356_v61 = vmax.f32 %v340_v47, 0.0  ;;  %v364_v62 = vmax.f32 %v348_v48, 0.0 }
 0x101   :  { %v339_v59 = vadd.f32 %v466_v16, %v232_v57  ;;  %v347_v60 = vadd.f32 %v466_v16, %v264_v58  ;;  %v354_v1 = vmax.f32 %v338_v51, 0.0  ;;  %v362_v2 = vmax.f32 %v346_v52, 0.0 }
 0x102   :  { %v357_v63 = vmax.f32 %v341_v55, 0.0  ;;  %v365_v0 = vmax.f32 %v349_v56, 0.0 }
 0x103   :  { %v355_v3 = vmax.f32 %v339_v59, 0.0  ;;  %v363_v4 = vmax.f32 %v347_v60, 0.0 }
 0x104   :  { %v517_v5 = vpack.c.bf16 %v357_v63, %v356_v61  ;;  %v537_v6 = vpack.c.bf16 %v365_v0, %v364_v62 }
 0x105   :  { %v512_v7 = vpack.c.bf16 %v355_v3, %v354_v1  ;;  %v532_v8 = vpack.c.bf16 %v363_v4, %v362_v2 }
 0x106   :  { %541 = vst [vmem:[%s724_s3 + $0x18] sm:$0xff] %v517_v5   ;;  %545 = vst [vmem:[%s724_s3 + $0x38] sm:$0xff] %v537_v6  }
 0x107   :  { %540 = vst [vmem:[%s724_s3 + $0x10] sm:$0xff] %v512_v7   ;;  %544 = vst [vmem:[%s724_s3 + $0x30] sm:$0xff] %v532_v8  }

// kernel: grace_encoder_forward.7
= control target key start
LH: loop header
LB: loop body
LE: loop exit
PB: predicated region body
PF: predicated region fallthrough
CT: control target
= control target key end

     0   :  { %s602_s1 = inlined_call_operand.vmem [shape: bf16[128,128], index: 1, kind: input, shape index: {}]   ;;  %s603_s0 = inlined_call_operand.vmem [shape: bf16[128,128], index: 0, kind: input, shape index: {}]   ;;  %s604_s2 = inlined_call_operand.vmem [shape: f32[1,128], index: 2, kind: input, shape index: {}]   ;;  %s605_s3 = inlined_call_operand.vmem [shape: f32[128,128], index: 3, kind: output, shape index: {}]  }
   0x1   :  { %v467_v0 = vld [vmem:[%s602_s1] sm:$0xff]   ;;  %v468_v1 = vld [vmem:[%s602_s1 + $0x8] sm:$0xff]   ;;  %v469_v2 = vld [vmem:[%s602_s1 + $0x10] sm:$0xff]  }
   0x2   :  { %419 = vmatprep.subr.bf16.mxu0 %v467_v0  ;;  %451 = vmatprep.subr.bf16.mxu1 %v467_v0  ;;  %v470_v3 = vld [vmem:[%s602_s1 + $0x18] sm:$0xff]   ;;  %v475_v4 = vld [vmem:[%s603_s0] sm:$0xff]   ;;  %v472_v7 = vld [vmem:[%s602_s1 + $0x28] sm:$0xff]  }
   0x3   :  { %420 = vmatpush3.bf16.msra.mxu0 %v467_v0  ;;  %459 = vmatpush3.bf16.msra.mxu1 %v467_v0  ;;  %v476_v5 = vld [vmem:[%s603_s0 + $0x20] sm:$0xff]   ;;  %v473_v8 = vld [vmem:[%s602_s1 + $0x30] sm:$0xff]   ;;  %v474_v9 = vld [vmem:[%s602_s1 + $0x38] sm:$0xff]  }
   0x4   :  { %421 = vmatprep.subr.bf16.mxu0 %v468_v1  ;;  %452 = vmatprep.subr.bf16.mxu1 %v468_v1  ;;  %v471_v6 = vld [vmem:[%s602_s1 + $0x20] sm:$0xff]   ;;  %v477_v10 = vld [vmem:[%s603_s0 + $0x8] sm:$0xff]   ;;  %v479_v12 = vld [vmem:[%s603_s0 + $0x10] sm:$0xff]  }
   0x5   :  { %435 = vmatprep.mubr.bf16.mxu0 %v475_v4  ;;  %443 = vmatprep.mubr.bf16.mxu1 %v476_v5  ;;  %v478_v11 = vld [vmem:[%s603_s0 + $0x28] sm:$0xff]   ;;  %v480_v13 = vld [vmem:[%s603_s0 + $0x30] sm:$0xff]   ;;  %v481_v14 = vld [vmem:[%s603_s0 + $0x18] sm:$0xff]  }
   0x6   :  { %v482_v15 = vld [vmem:[%s603_s0 + $0x38] sm:$0xff]   ;;  %v402_v16 = vld [vmem:[%s604_s2] ss:$0 sm:$0xff] }
   0x7   :  { %422 = vmatpush3.bf16.msra.mxu0 %v468_v1  ;;  %460 = vmatpush3.bf16.msra.mxu1 %v468_v1 }
   0x8   :  { %423 = vmatprep.subr.bf16.mxu0 %v469_v2  ;;  %453 = vmatprep.subr.bf16.mxu1 %v469_v2 }
   0xb   :  { %424 = vmatpush3.bf16.msra.mxu0 %v469_v2  ;;  %461 = vmatpush3.bf16.msra.mxu1 %v469_v2 }
   0xc   :  { %425 = vmatprep.subr.bf16.mxu0 %v470_v3  ;;  %454 = vmatprep.subr.bf16.mxu1 %v470_v3 }
   0xf   :  { %426 = vmatpush3.bf16.msra.mxu0 %v470_v3  ;;  %462 = vmatpush3.bf16.msra.mxu1 %v470_v3 }
  0x10   :  { %427 = vmatprep.subr.bf16.mxu0 %v471_v6  ;;  %455 = vmatprep.subr.bf16.mxu1 %v471_v6 }
  0x13   :  { %428 = vmatpush3.bf16.msra.mxu0 %v471_v6  ;;  %463 = vmatpush3.bf16.msra.mxu1 %v471_v6 }
  0x14   :  { %429 = vmatprep.subr.bf16.mxu0 %v472_v7  ;;  %456 = vmatprep.subr.bf16.mxu1 %v472_v7 }
  0x17   :  { %430 = vmatpush3.bf16.msra.mxu0 %v472_v7  ;;  %464 = vmatpush3.bf16.msra.mxu1 %v472_v7 }
  0x18   :  { %431 = vmatprep.subr.bf16.mxu0 %v473_v8  ;;  %457 = vmatprep.subr.bf16.mxu1 %v473_v8 }
  0x1b   :  { %432 = vmatpush3.bf16.msra.mxu0 %v473_v8  ;;  %465 = vmatpush3.bf16.msra.mxu1 %v473_v8 }
  0x1c   :  { %433 = vmatprep.subr.bf16.mxu0 %v474_v9  ;;  %458 = vmatprep.subr.bf16.mxu1 %v474_v9 }
  0x1f   :  { %434 = vmatpush3.bf16.msra.mxu0 %v474_v9  ;;  %466 = vmatpush3.bf16.msra.mxu1 %v474_v9 }
  0x22   :  { %436 = vmatmul.mubr.bf16.vlgmr.msra.gmra.mrb[0].mxu0 %v477_v10  ;;  %444 = vmatmul.mubr.bf16.vlgmr.msra.gmra.mrb[0].mxu1 %v478_v11 }
  0x23   :  { %439 = vmatprep.mubr.bf16.mxu0 %v479_v12  ;;  %447 = vmatprep.mubr.bf16.mxu1 %v480_v13 }
  0x2a   :  { %440 = vmatmul.mubr.bf16.gmra.mrb[4].mxu0 %v481_v14  ;;  %448 = vmatmul.mubr.bf16.gmra.mrb[4].mxu1 %v482_v15 }
  0xf5   :  { %v437_v17 = vpop.f32.mrb[0].mxu0  ;;  %v445_v18 = vpop.f32.mrb[0].mxu1 }
  0xf6   :  { %v336_v19 = vadd.f32 %v437_v17, %v402_v16  ;;  %v344_v20 = vadd.f32 %v445_v18, %v402_v16  ;;  %v213_v21 = vpop.f32.mrb[1].mxu0  ;;  %v245_v22 = vpop.f32.mrb[1].mxu1 }
  0xf7   :  { %v334_v23 = vadd.f32 %v402_v16, %v213_v21  ;;  %v342_v24 = vadd.f32 %v402_v16, %v245_v22  ;;  %v438_v25 = vpop.f32.mrb[2].mxu0  ;;  %v446_v26 = vpop.f32.mrb[2].mxu1 }
  0xf8   :  { %v352_v27 = vmax.f32 %v336_v19, 0.0  ;;  %v360_v28 = vmax.f32 %v344_v20, 0.0  ;;  %v337_v29 = vadd.f32 %v438_v25, %v402_v16  ;;  %v345_v30 = vadd.f32 %v446_v26, %v402_v16  ;;  %v216_v31 = vpop.f32.mrb[3].mxu0  ;;  %v248_v32 = vpop.f32.mrb[3].mxu1 }
  0xf9   :  { %v350_v33 = vmax.f32 %v334_v23, 0.0  ;;  %v358_v34 = vmax.f32 %v342_v24, 0.0  ;;  %v335_v35 = vadd.f32 %v402_v16, %v216_v31  ;;  %v343_v36 = vadd.f32 %v402_v16, %v248_v32 }
  0xfa   :  { %368 = vst [vmem:[%s605_s3 + $0x10] sm:$0xff] %v352_v27  ;;  %376 = vst [vmem:[%s605_s3 + $0x50] sm:$0xff] %v360_v28  ;;  %v353_v37 = vmax.f32 %v337_v29, 0.0  ;;  %v361_v38 = vmax.f32 %v345_v30, 0.0 }
  0xfb   :  { %366 = vst [vmem:[%s605_s3] sm:$0xff] %v350_v33  ;;  %374 = vst [vmem:[%s605_s3 + $0x40] sm:$0xff] %v358_v34  ;;  %v351_v39 = vmax.f32 %v335_v35, 0.0  ;;  %v359_v40 = vmax.f32 %v343_v36, 0.0 }
  0xfc   :  { %369 = vst [vmem:[%s605_s3 + $0x18] sm:$0xff] %v353_v37  ;;  %377 = vst [vmem:[%s605_s3 + $0x58] sm:$0xff] %v361_v38 }
  0xfd   :  { %367 = vst [vmem:[%s605_s3 + $0x8] sm:$0xff] %v351_v39  ;;  %375 = vst [vmem:[%s605_s3 + $0x48] sm:$0xff] %v359_v40  ;;  %v441_v41 = vpop.f32.mrb[4].mxu0  ;;  %v449_v42 = vpop.f32.mrb[4].mxu1 }
  0xfe   :  { %v340_v43 = vadd.f32 %v441_v41, %v402_v16  ;;  %v348_v44 = vadd.f32 %v449_v42, %v402_v16  ;;  %v229_v45 = vpop.f32.mrb[5].mxu0  ;;  %v261_v46 = vpop.f32.mrb[5].mxu1 }
  0xff   :  { %v338_v47 = vadd.f32 %v402_v16, %v229_v45  ;;  %v346_v48 = vadd.f32 %v402_v16, %v261_v46  ;;  %v442_v49 = vpop.f32.mrb[6].mxu0  ;;  %v450_v50 = vpop.f32.mrb[6].mxu1 }
 0x100   :  { %v356_v51 = vmax.f32 %v340_v43, 0.0  ;;  %v364_v52 = vmax.f32 %v348_v44, 0.0  ;;  %v341_v53 = vadd.f32 %v442_v49, %v402_v16  ;;  %v349_v54 = vadd.f32 %v450_v50, %v402_v16  ;;  %v232_v55 = vpop.f32.mrb[7].mxu0  ;;  %v264_v56 = vpop.f32.mrb[7].mxu1 }
 0x101   :  { %v354_v57 = vmax.f32 %v338_v47, 0.0  ;;  %v362_v58 = vmax.f32 %v346_v48, 0.0  ;;  %v339_v59 = vadd.f32 %v402_v16, %v232_v55  ;;  %v347_v60 = vadd.f32 %v402_v16, %v264_v56 }
 0x102   :  { %372 = vst [vmem:[%s605_s3 + $0x30] sm:$0xff] %v356_v51  ;;  %380 = vst [vmem:[%s605_s3 + $0x70] sm:$0xff] %v364_v52  ;;  %v357_v61 = vmax.f32 %v341_v53, 0.0  ;;  %v365_v62 = vmax.f32 %v349_v54, 0.0 }
 0x103   :  { %370 = vst [vmem:[%s605_s3 + $0x20] sm:$0xff] %v354_v57  ;;  %378 = vst [vmem:[%s605_s3 + $0x60] sm:$0xff] %v362_v58  ;;  %v355_v63 = vmax.f32 %v339_v59, 0.0  ;;  %v363_v0 = vmax.f32 %v347_v60, 0.0 }
 0x104   :  { %373 = vst [vmem:[%s605_s3 + $0x38] sm:$0xff] %v357_v61  ;;  %381 = vst [vmem:[%s605_s3 + $0x78] sm:$0xff] %v365_v62 }
 0x105   :  { %371 = vst [vmem:[%s605_s3 + $0x28] sm:$0xff] %v355_v63  ;;  %379 = vst [vmem:[%s605_s3 + $0x68] sm:$0xff] %v363_v0 }

</bundles_post_ra>
